<compile_context>
chip_gen: v5e
topology: v5e:2x2
jax: 0.10.0
libtpu: 0.0.40
codegen_flags: <defaults>
</compile_context>

<pallas_src>
import functools

import jax
import jax.numpy as jnp
from jax.experimental import pallas as pl
from jax.experimental.pallas import tpu as pltpu

TILE_B = 128   # batch tile (rows per grid step)
LANE = 128     # lane width: pad all feature dims to a multiple of this


def _round_up(n, m):
    return ((n + m - 1) // m) * m


def _mlp_kernel(x_ref, w1_ref, b1_ref, w2_ref, b2_ref, w3_ref, b3_ref, o_ref):
    # x, w* are bf16; biases and accumulation are f32.
    x = x_ref[...]

    # fc1 + ReLU
    h1 = jnp.dot(x, w1_ref[...], preferred_element_type=jnp.float32)
    h1 = jnp.maximum(h1 + b1_ref[...], 0.0)

    # fc2 + ReLU
    h2 = jnp.dot(h1.astype(jnp.bfloat16), w2_ref[...],
                 preferred_element_type=jnp.float32)
    h2 = jnp.maximum(h2 + b2_ref[...], 0.0)

    # fc3 (no activation)
    out = jnp.dot(h2.astype(jnp.bfloat16), w3_ref[...],
                  preferred_element_type=jnp.float32)
    o_ref[...] = (out + b3_ref[...]).astype(o_ref.dtype)


def _pad2d(a, rows, cols):
    return jnp.pad(a, ((0, rows - a.shape[0]), (0, cols - a.shape[1])))


@jax.jit
def ann_forward(x, w1, b1, w2, b2, w3, b3):
    batch, state_size = x.shape
    hidden1 = w1.shape[1]
    hidden2 = w2.shape[1]
    action_size = w3.shape[1]

    # Padded (lane-dense) dimensions.
    in_p = _round_up(state_size, LANE)
    h1_p = _round_up(hidden1, LANE)
    h2_p = _round_up(hidden2, LANE)
    out_p = _round_up(action_size, LANE)
    b_p = _round_up(batch, TILE_B)

    # Cast MXU operands to bf16; keep biases f32. Zero padding keeps the math
    # identical (extra rows/cols contribute 0; ReLU(0)=0).
    x_p = _pad2d(x.astype(jnp.bfloat16), b_p, in_p)
    w1_p = _pad2d(w1.astype(jnp.bfloat16), in_p, h1_p)
    w2_p = _pad2d(w2.astype(jnp.bfloat16), h1_p, h2_p)
    w3_p = _pad2d(w3.astype(jnp.bfloat16), h2_p, out_p)
    b1_p = _pad2d(b1.reshape(1, -1).astype(jnp.float32), 1, h1_p)
    b2_p = _pad2d(b2.reshape(1, -1).astype(jnp.float32), 1, h2_p)
    b3_p = _pad2d(b3.reshape(1, -1).astype(jnp.float32), 1, out_p)

    grid = (b_p // TILE_B,)

    flops = 2 * b_p * (in_p * h1_p + h1_p * h2_p + h2_p * out_p)
    bytes_accessed = (
        x_p.size * 2 + w1_p.size * 2 + w2_p.size * 2 + w3_p.size * 2
        + (b1_p.size + b2_p.size + b3_p.size) * 4
        + b_p * out_p * 4
    )

    weight_spec = lambda shape: pl.BlockSpec(shape, lambda i: (0, 0))

    out_padded = pl.pallas_call(
        _mlp_kernel,
        out_shape=jax.ShapeDtypeStruct((b_p, out_p), jnp.float32),
        grid=grid,
        in_specs=[
            pl.BlockSpec((TILE_B, in_p), lambda i: (i, 0)),   # x tile
            weight_spec((in_p, h1_p)),                        # w1 (resident)
            weight_spec((1, h1_p)),                           # b1
            weight_spec((h1_p, h2_p)),                        # w2
            weight_spec((1, h2_p)),                           # b2
            weight_spec((h2_p, out_p)),                       # w3
            weight_spec((1, out_p)),                          # b3
        ],
        out_specs=pl.BlockSpec((TILE_B, out_p), lambda i: (i, 0)),
        compiler_params=pltpu.CompilerParams(
            dimension_semantics=("parallel",)),
        cost_estimate=pl.CostEstimate(
            flops=flops, bytes_accessed=bytes_accessed, transcendentals=0),
    )(x_p, w1_p, b1_p, w2_p, b2_p, w3_p, b3_p)

    return out_padded[:batch, :action_size]


def init_linear_params(key, in_features, out_features):
    # Mirrors PyTorch nn.Linear default init: U(-1/sqrt(in), 1/sqrt(in)).
    kw, kb = jax.random.split(key)
    bound = 1.0 / jnp.sqrt(jnp.float32(in_features))
    # Stored as (in, out) so the kernel computes x @ W (PyTorch stores (out, in)).
    w = jax.random.uniform(kw, (in_features, out_features), jnp.float32, -bound, bound)
    b = jax.random.uniform(kb, (out_features,), jnp.float32, -bound, bound)
    return w, b


def reference_forward_f32(x, w1, b1, w2, b2, w3, b3):
    h1 = jnp.maximum(x @ w1 + b1, 0.0)
    h2 = jnp.maximum(h1 @ w2 + b2, 0.0)
    return h2 @ w3 + b3


def reference_forward_bf16(x, w1, b1, w2, b2, w3, b3):
    # Mirrors the kernel's quantization: bf16 MXU inputs, f32 accumulation.
    bf = jnp.bfloat16
    h1 = jnp.dot(x.astype(bf), w1.astype(bf), preferred_element_type=jnp.float32) + b1
    h1 = jnp.maximum(h1, 0.0)
    h2 = jnp.dot(h1.astype(bf), w2.astype(bf), preferred_element_type=jnp.float32) + b2
    h2 = jnp.maximum(h2, 0.0)
    return jnp.dot(h2.astype(bf), w3.astype(bf), preferred_element_type=jnp.float32) + b3


if __name__ == "__main__":
    state_size = 8
    action_size = 4
    hidden = 64
    batch = 2

    key = jax.random.PRNGKey(0)
    k_x, k1, k2, k3 = jax.random.split(key, 4)

    x = jax.random.normal(k_x, (batch, state_size), jnp.float32)
    w1, b1 = init_linear_params(k1, state_size, hidden)
    w2, b2 = init_linear_params(k2, hidden, hidden)
    w3, b3 = init_linear_params(k3, hidden, action_size)

    out = ann_forward(x, w1, b1, w2, b2, w3, b3)
    out = jax.block_until_ready(out)

    ref_bf16 = reference_forward_bf16(x, w1, b1, w2, b2, w3, b3)
    ref_f32 = reference_forward_f32(x, w1, b1, w2, b2, w3, b3)

    assert out.shape == (batch, action_size)
    assert jnp.allclose(out, ref_bf16, atol=2e-3, rtol=2e-3)
    assert jnp.allclose(out, ref_f32, atol=5e-2, rtol=5e-2)

    print("KERNEL_OK")
</pallas_src>

<mosaic_0001>
module attributes {stable_mosaic.version = 11 : i64} {
  func.func @_mlp_kernel(%arg0: i32, %arg1: memref<128x128xbf16, #tpu.memory_space<vmem>>, %arg2: memref<128x128xbf16, #tpu.memory_space<vmem>>, %arg3: memref<1x128xf32, #tpu.memory_space<vmem>>, %arg4: memref<128x128xbf16, #tpu.memory_space<vmem>>, %arg5: memref<1x128xf32, #tpu.memory_space<vmem>>, %arg6: memref<128x128xbf16, #tpu.memory_space<vmem>>, %arg7: memref<1x128xf32, #tpu.memory_space<vmem>>, %arg8: memref<128x128xf32, #tpu.memory_space<vmem>>) attributes {dimension_semantics = [#tpu.dimension_semantics<parallel>], iteration_bounds = array<i64: 1>, scalar_prefetch = 0 : i64, scratch_operands = 0 : i64, tpu.core_type = #tpu.core_type<tc>, window_params = [{transform_indices = @transform_0, window_bounds = array<i64: 128, 128>}, {pipeline_mode = #tpu.pipeline_mode<synchronous>, transform_indices = @transform_1, window_bounds = array<i64: 128, 128>}, {pipeline_mode = #tpu.pipeline_mode<synchronous>, transform_indices = @transform_2, window_bounds = array<i64: 1, 128>}, {pipeline_mode = #tpu.pipeline_mode<synchronous>, transform_indices = @transform_3, window_bounds = array<i64: 128, 128>}, {pipeline_mode = #tpu.pipeline_mode<synchronous>, transform_indices = @transform_4, window_bounds = array<i64: 1, 128>}, {pipeline_mode = #tpu.pipeline_mode<synchronous>, transform_indices = @transform_5, window_bounds = array<i64: 128, 128>}, {pipeline_mode = #tpu.pipeline_mode<synchronous>, transform_indices = @transform_6, window_bounds = array<i64: 1, 128>}, {transform_indices = @transform_7, window_bounds = array<i64: 128, 128>}]} {
    %c0 = arith.constant 0 : index
    %c0_0 = arith.constant 0 : index
    %0 = vector.load %arg1[%c0, %c0_0] : memref<128x128xbf16, #tpu.memory_space<vmem>>, vector<128x128xbf16>
    %c0_1 = arith.constant 0 : index
    %c0_2 = arith.constant 0 : index
    %1 = vector.load %arg2[%c0_1, %c0_2] : memref<128x128xbf16, #tpu.memory_space<vmem>>, vector<128x128xbf16>
    %cst = arith.constant dense<0.000000e+00> : vector<128x128xf32>
    %2 = tpu.matmul %0, %1, %cst {dimension_numbers = #tpu.dot_dimension_numbers<[1], [0], [0], [1], [0, 0, 1, 1], [], []>} : vector<128x128xbf16>, vector<128x128xbf16>, vector<128x128xf32> -> vector<128x128xf32>
    %c0_3 = arith.constant 0 : index
    %c0_4 = arith.constant 0 : index
    %3 = vector.load %arg3[%c0_3, %c0_4] : memref<1x128xf32, #tpu.memory_space<vmem>>, vector<1x128xf32>
    %4 = vector.broadcast %3 : vector<1x128xf32> to vector<128x128xf32>
    %5 = arith.addf %2, %4 : vector<128x128xf32>
    %cst_5 = arith.constant 0.000000e+00 : f32
    %6 = vector.broadcast %cst_5 : f32 to vector<128x128xf32>
    %7 = arith.maximumf %5, %6 : vector<128x128xf32>
    %8 = arith.truncf %7 : vector<128x128xf32> to vector<128x128xbf16>
    %c0_6 = arith.constant 0 : index
    %c0_7 = arith.constant 0 : index
    %9 = vector.load %arg4[%c0_6, %c0_7] : memref<128x128xbf16, #tpu.memory_space<vmem>>, vector<128x128xbf16>
    %cst_8 = arith.constant dense<0.000000e+00> : vector<128x128xf32>
    %10 = tpu.matmul %8, %9, %cst_8 {dimension_numbers = #tpu.dot_dimension_numbers<[1], [0], [0], [1], [0, 0, 1, 1], [], []>} : vector<128x128xbf16>, vector<128x128xbf16>, vector<128x128xf32> -> vector<128x128xf32>
    %c0_9 = arith.constant 0 : index
    %c0_10 = arith.constant 0 : index
    %11 = vector.load %arg5[%c0_9, %c0_10] : memref<1x128xf32, #tpu.memory_space<vmem>>, vector<1x128xf32>
    %12 = vector.broadcast %11 : vector<1x128xf32> to vector<128x128xf32>
    %13 = arith.addf %10, %12 : vector<128x128xf32>
    %cst_11 = arith.constant 0.000000e+00 : f32
    %14 = vector.broadcast %cst_11 : f32 to vector<128x128xf32>
    %15 = arith.maximumf %13, %14 : vector<128x128xf32>
    %16 = arith.truncf %15 : vector<128x128xf32> to vector<128x128xbf16>
    %c0_12 = arith.constant 0 : index
    %c0_13 = arith.constant 0 : index
    %17 = vector.load %arg6[%c0_12, %c0_13] : memref<128x128xbf16, #tpu.memory_space<vmem>>, vector<128x128xbf16>
    %cst_14 = arith.constant dense<0.000000e+00> : vector<128x128xf32>
    %18 = tpu.matmul %16, %17, %cst_14 {dimension_numbers = #tpu.dot_dimension_numbers<[1], [0], [0], [1], [0, 0, 1, 1], [], []>} : vector<128x128xbf16>, vector<128x128xbf16>, vector<128x128xf32> -> vector<128x128xf32>
    %c0_15 = arith.constant 0 : index
    %c0_16 = arith.constant 0 : index
    %19 = vector.load %arg7[%c0_15, %c0_16] : memref<1x128xf32, #tpu.memory_space<vmem>>, vector<1x128xf32>
    %20 = vector.broadcast %19 : vector<1x128xf32> to vector<128x128xf32>
    %21 = arith.addf %18, %20 : vector<128x128xf32>
    %c0_17 = arith.constant 0 : index
    %c0_18 = arith.constant 0 : index
    %22 = vector.load %arg8[%c0_17, %c0_18] : memref<128x128xf32, #tpu.memory_space<vmem>>, vector<128x128xf32>
    tpu.vector_store %arg8[%c0_17, %c0_18], %21 {strides = array<i32>} : memref<128x128xf32, #tpu.memory_space<vmem>>, vector<128x128xf32>,
    return
  }
  func.func @transform_0(%arg0: i32) -> (i32, i32) {
    %c0_i32 = arith.constant 0 : i32
    %c0_i32_0 = arith.constant 0 : i32
    return %arg0, %c0_i32 : i32, i32
  }
  func.func @transform_1(%arg0: i32) -> (i32, i32) {
    %c0_i32 = arith.constant 0 : i32
    %c0_i32_0 = arith.constant 0 : i32
    %c0_i32_1 = arith.constant 0 : i32
    return %c0_i32, %c0_i32_0 : i32, i32
  }
  func.func @transform_2(%arg0: i32) -> (i32, i32) {
    %c0_i32 = arith.constant 0 : i32
    %c0_i32_0 = arith.constant 0 : i32
    %c0_i32_1 = arith.constant 0 : i32
    return %c0_i32, %c0_i32_0 : i32, i32
  }
  func.func @transform_3(%arg0: i32) -> (i32, i32) {
    %c0_i32 = arith.constant 0 : i32
    %c0_i32_0 = arith.constant 0 : i32
    %c0_i32_1 = arith.constant 0 : i32
    return %c0_i32, %c0_i32_0 : i32, i32
  }
  func.func @transform_4(%arg0: i32) -> (i32, i32) {
    %c0_i32 = arith.constant 0 : i32
    %c0_i32_0 = arith.constant 0 : i32
    %c0_i32_1 = arith.constant 0 : i32
    return %c0_i32, %c0_i32_0 : i32, i32
  }
  func.func @transform_5(%arg0: i32) -> (i32, i32) {
    %c0_i32 = arith.constant 0 : i32
    %c0_i32_0 = arith.constant 0 : i32
    %c0_i32_1 = arith.constant 0 : i32
    return %c0_i32, %c0_i32_0 : i32, i32
  }
  func.func @transform_6(%arg0: i32) -> (i32, i32) {
    %c0_i32 = arith.constant 0 : i32
    %c0_i32_0 = arith.constant 0 : i32
    %c0_i32_1 = arith.constant 0 : i32
    return %c0_i32, %c0_i32_0 : i32, i32
  }
  func.func @transform_7(%arg0: i32) -> (i32, i32) {
    %c0_i32 = arith.constant 0 : i32
    %c0_i32_0 = arith.constant 0 : i32
    return %arg0, %c0_i32 : i32, i32
  }
}

</mosaic_0001>

<bundles_post_ra>
// kernel: ann_forward.1
= control target key start
LH: loop header
LB: loop body
LE: loop exit
PB: predicated region body
PF: predicated region fallthrough
CT: control target
= control target key end

     0   :  { %s907_s1 = inlined_call_operand.vmem [shape: bf16[128,128], index: 1, kind: input, shape index: {}]   ;;  %s908_s2 = inlined_call_operand.vmem [shape: f32[1,128], index: 2, kind: input, shape index: {}]   ;;  %s909_s0 = inlined_call_operand.vmem [shape: bf16[128,128], index: 0, kind: input, shape index: {}]   ;;  %s910_s3 = inlined_call_operand.vmem [shape: bf16[128,128], index: 3, kind: input, shape index: {}]   ;;  %s911_s4 = inlined_call_operand.vmem [shape: f32[1,128], index: 4, kind: input, shape index: {}]   ;;  %s912_s5 = inlined_call_operand.vmem [shape: bf16[128,128], index: 5, kind: input, shape index: {}]   ;;  %s913_s6 = inlined_call_operand.vmem [shape: f32[1,128], index: 6, kind: input, shape index: {}]   ;;  %s914_s7 = inlined_call_operand.vmem [shape: f32[128,128], index: 7, kind: output, shape index: {}]  }
   0x1   :  { %v652_v0 = vld [vmem:[%s907_s1 + $0x38] sm:$0xff]  ;;  %v651_v1 = vld [vmem:[%s907_s1 + $0x30] sm:$0xff]  ;;  %v650_v2 = vld [vmem:[%s907_s1 + $0x28] sm:$0xff] }
   0x2   :  { %158 = vmatpush.bf16.msra.mxu0 %v652_v0  ;;  %669 = vmatpush.bf16.msra.mxu3 %v652_v0  ;;  %v649_v3 = vld [vmem:[%s907_s1 + $0x20] sm:$0xff]  ;;  %v648_v4 = vld [vmem:[%s907_s1 + $0x18] sm:$0xff]  ;;  %v647_v5 = vld [vmem:[%s907_s1 + $0x10] sm:$0xff] }
   0x3   :  { %v646_v6 = vld [vmem:[%s907_s1 + $0x8] sm:$0xff]  ;;  %v645_v7 = vld [vmem:[%s907_s1] sm:$0xff]  ;;  %v643_v9 = vld [vmem:[%s909_s0 + $0x30] sm:$0xff] }
   0x4   :  { %v637_v8 = vld [vmem:[%s909_s0] sm:$0xff]  ;;  %v638_v10 = vld [vmem:[%s909_s0 + $0x8] sm:$0xff]  ;;  %v644_v11 = vld [vmem:[%s909_s0 + $0x38] sm:$0xff] }
   0x5   :  { %v639_v12 = vld [vmem:[%s909_s0 + $0x10] sm:$0xff]  ;;  %v640_v13 = vld [vmem:[%s909_s0 + $0x18] sm:$0xff]  ;;  %v658_v16 = vld [vmem:[%s910_s3 + $0x28] sm:$0xff] }
   0x6   :  { %159 = vmatpush.bf16.msra.mxu0 %v651_v1  ;;  %670 = vmatpush.bf16.msra.mxu3 %v651_v1  ;;  %v660_v14 = vld [vmem:[%s910_s3 + $0x38] sm:$0xff]  ;;  %v659_v15 = vld [vmem:[%s910_s3 + $0x30] sm:$0xff]  ;;  %v657_v17 = vld [vmem:[%s910_s3 + $0x20] sm:$0xff] }
   0x7   :  { %299 = vmatpush.bf16.msra.mxu1 %v660_v14  ;;  %v641_v18 = vld [vmem:[%s909_s0 + $0x20] sm:$0xff]  ;;  %v642_v19 = vld [vmem:[%s909_s0 + $0x28] sm:$0xff]  ;;  %v656_v20 = vld [vmem:[%s910_s3 + $0x18] sm:$0xff] }
   0x8   :  { %v655_v21 = vld [vmem:[%s910_s3 + $0x10] sm:$0xff]  ;;  %v654_v22 = vld [vmem:[%s910_s3 + $0x8] sm:$0xff]  ;;  %v653_v23 = vld [vmem:[%s910_s3] sm:$0xff] }
   0x9   :  { %v811_v25 = vld [vmem:[%s908_s2] ss:$0 sm:$0xff] }
   0xa   :  { %160 = vmatpush.bf16.msra.mxu0 %v650_v2  ;;  %671 = vmatpush.bf16.msra.mxu3 %v650_v2 }
   0xb   :  { %300 = vmatpush.bf16.msra.mxu1 %v659_v15 }
   0xe   :  { %161 = vmatpush.bf16.msra.mxu0 %v649_v3  ;;  %672 = vmatpush.bf16.msra.mxu3 %v649_v3  ;;  %v668_v3 = vld [vmem:[%s912_s5 + $0x38] sm:$0xff] }
   0xf   :  { %301 = vmatpush.bf16.msra.mxu1 %v658_v16  ;;  %440 = vmatpush.bf16.msra.mxu2 %v668_v3 }
  0x12   :  { %162 = vmatpush.bf16.msra.mxu0 %v648_v4  ;;  %673 = vmatpush.bf16.msra.mxu3 %v648_v4 }
  0x13   :  { %302 = vmatpush.bf16.msra.mxu1 %v657_v17 }
  0x16   :  { %163 = vmatpush.bf16.msra.mxu0 %v647_v5  ;;  %674 = vmatpush.bf16.msra.mxu3 %v647_v5  ;;  %v667_v5 = vld [vmem:[%s912_s5 + $0x30] sm:$0xff] }
  0x17   :  { %303 = vmatpush.bf16.msra.mxu1 %v656_v20  ;;  %441 = vmatpush.bf16.msra.mxu2 %v667_v5 }
  0x1a   :  { %164 = vmatpush.bf16.msra.mxu0 %v646_v6  ;;  %675 = vmatpush.bf16.msra.mxu3 %v646_v6  ;;  %v666_v6 = vld [vmem:[%s912_s5 + $0x28] sm:$0xff] }
  0x1b   :  { %304 = vmatpush.bf16.msra.mxu1 %v655_v21  ;;  %442 = vmatpush.bf16.msra.mxu2 %v666_v6 }
  0x1e   :  { %165 = vmatpush.bf16.msra.mxu0 %v645_v7  ;;  %676 = vmatpush.bf16.msra.mxu3 %v645_v7 }
  0x1f   :  { %305 = vmatpush.bf16.msra.mxu1 %v654_v22 }
  0x21   :  { %166 = vmatmul.bf16.vlgmr.msra.gmra.mxu0 %v637_v8  ;;  %196 = vmatmul.bf16.vlgmr.msra.gmra.mxu3 %v643_v9 }
  0x22   :  { %677 = vmatpush.bf16.msrb.mxu3 %v660_v14 }
  0x23   :  { %306 = vmatpush.bf16.msra.mxu1 %v653_v23 }
  0x26   :  { %678 = vmatpush.bf16.msrb.mxu3 %v659_v15 }
  0x2a   :  { %679 = vmatpush.bf16.msrb.mxu3 %v658_v16 }
  0x2e   :  { %680 = vmatpush.bf16.msrb.mxu3 %v657_v17 }
  0x31   :  { %171 = vmatmul.bf16.gmra.mxu0 %v638_v10  ;;  %201 = vmatmul.bf16.gmra.mxu3 %v644_v11  ;;  %v665_v10 = vld [vmem:[%s912_s5 + $0x20] sm:$0xff] }
  0x32   :  { %681 = vmatpush.bf16.msrb.mxu3 %v656_v20  ;;  %443 = vmatpush.bf16.msra.mxu2 %v665_v10 }
  0x36   :  { %682 = vmatpush.bf16.msrb.mxu3 %v655_v21  ;;  %v664_v21 = vld [vmem:[%s912_s5 + $0x18] sm:$0xff] }
  0x37   :  { %444 = vmatpush.bf16.msra.mxu2 %v664_v21 }
  0x3a   :  { %683 = vmatpush.bf16.msrb.mxu3 %v654_v22  ;;  %v663_v22 = vld [vmem:[%s912_s5 + $0x10] sm:$0xff] }
  0x3b   :  { %445 = vmatpush.bf16.msra.mxu2 %v663_v22 }
  0x3e   :  { %684 = vmatpush.bf16.msrb.mxu3 %v653_v23  ;;  %v662_v23 = vld [vmem:[%s912_s5 + $0x8] sm:$0xff] }
  0x3f   :  { %446 = vmatpush.bf16.msra.mxu2 %v662_v23 }
  0x41   :  { %176 = vmatmul.bf16.gmra.mxu0 %v639_v12 }
  0x42   :  { %685 = vmatpush.bf16.msra.mxu3 %v668_v3 }
  0x46   :  { %686 = vmatpush.bf16.msra.mxu3 %v667_v5 }
  0x4a   :  { %687 = vmatpush.bf16.msra.mxu3 %v666_v6 }
  0x4e   :  { %688 = vmatpush.bf16.msra.mxu3 %v665_v10 }
  0x51   :  { %181 = vmatmul.bf16.gmra.mxu0 %v640_v13 }
  0x52   :  { %689 = vmatpush.bf16.msra.mxu3 %v664_v21 }
  0x56   :  { %690 = vmatpush.bf16.msra.mxu3 %v663_v22 }
  0x5a   :  { %691 = vmatpush.bf16.msra.mxu3 %v662_v23 }
  0x61   :  { %186 = vmatmul.bf16.gmra.mxu0 %v641_v18 }
  0x71   :  { %191 = vmatmul.bf16.gmra.mxu0 %v642_v19 }
  0x9e   :  { %v167_v24 = vpop.f32.mrf.mxu0 }
  0x9f   :  { %v168_v27 = vadd.f32 %v811_v25, %v167_v24  ;;  %v661_v24 = vld [vmem:[%s912_s5] sm:$0xff] }
  0xa0   :  { %447 = vmatpush.bf16.msra.mxu2 %v661_v24  ;;  %692 = vmatpush.bf16.msra.mxu3 %v661_v24 }
  0xa1   :  { %v207_v30 = vmax.f32 %v168_v27, 0.0 }
  0xa4   :  { %v197_v26 = vpop.f32.mrf.mxu3 }
  0xa5   :  { %v198_v32 = vadd.f32 %v811_v25, %v197_v26  ;;  %v694_v26 = vld [vmem:[%s911_s4] ss:$0 sm:$0xff] }
  0xa6   :  { %v169_v28 = vpop.f32.mrf.mxu0 }
  0xa7   :  { %v170_v29 = vadd.f32 %v811_v25, %v169_v28  ;;  %v219_v35 = vmax.f32 %v198_v32, 0.0 }
  0xa9   :  { %v208_v31 = vmax.f32 %v170_v29, 0.0 }
  0xab   :  { %v223_v33 = vpack.c.bf16 %v208_v31, %v207_v30 }
  0xac   :  { %v199_v34 = vpop.f32.mrf.mxu3 }
  0xad   :  { %307 = vmatmul.bf16.vlgmr.msra.gmra.mxu1 %v223_v33  ;;  %v200_v36 = vadd.f32 %v811_v25, %v199_v34 }
  0xae   :  { %v172_v37 = vpop.f32.mrf.mxu0 }
  0xaf   :  { %v220_v38 = vmax.f32 %v200_v36, 0.0  ;;  %v173_v41 = vadd.f32 %v811_v25, %v172_v37 }
  0xb1   :  { %v229_v39 = vpack.c.bf16 %v220_v38, %v219_v35  ;;  %v209_v44 = vmax.f32 %v173_v41, 0.0 }
  0xb3   :  { %337 = vmatmul.bf16.vlgmr.msrb.gmra.mxu3 %v229_v39 }
  0xb4   :  { %v202_v40 = vpop.f32.mrf.mxu3 }
  0xb5   :  { %v203_v46 = vadd.f32 %v811_v25, %v202_v40 }
  0xb6   :  { %v174_v42 = vpop.f32.mrf.mxu0 }
  0xb7   :  { %v175_v43 = vadd.f32 %v811_v25, %v174_v42  ;;  %v221_v49 = vmax.f32 %v203_v46, 0.0 }
  0xb9   :  { %v210_v45 = vmax.f32 %v175_v43, 0.0 }
  0xbb   :  { %v224_v47 = vpack.c.bf16 %v210_v45, %v209_v44 }
  0xbc   :  { %v204_v48 = vpop.f32.mrf.mxu3 }
  0xbd   :  { %312 = vmatmul.bf16.gmra.mxu1 %v224_v47  ;;  %v205_v50 = vadd.f32 %v811_v25, %v204_v48 }
  0xbe   :  { %v177_v51 = vpop.f32.mrf.mxu0 }
  0xbf   :  { %v222_v52 = vmax.f32 %v205_v50, 0.0  ;;  %v178_v54 = vadd.f32 %v811_v25, %v177_v51 }
  0xc1   :  { %v230_v53 = vpack.c.bf16 %v222_v52, %v221_v49  ;;  %v211_v57 = vmax.f32 %v178_v54, 0.0 }
  0xc3   :  { %342 = vmatmul.bf16.gmra.mxu3 %v230_v53 }
  0xc6   :  { %v179_v55 = vpop.f32.mrf.mxu0 }
  0xc7   :  { %v180_v56 = vadd.f32 %v811_v25, %v179_v55 }
  0xc9   :  { %v212_v58 = vmax.f32 %v180_v56, 0.0 }
  0xcb   :  { %v225_v59 = vpack.c.bf16 %v212_v58, %v211_v57 }
  0xcd   :  { %317 = vmatmul.bf16.gmra.mxu1 %v225_v59 }
  0xce   :  { %v182_v60 = vpop.f32.mrf.mxu0 }
  0xcf   :  { %v183_v61 = vadd.f32 %v811_v25, %v182_v60 }
  0xd1   :  { %v213_v0 = vmax.f32 %v183_v61, 0.0 }
  0xd6   :  { %v184_v62 = vpop.f32.mrf.mxu0 }
  0xd7   :  { %v185_v63 = vadd.f32 %v811_v25, %v184_v62 }
  0xd9   :  { %v214_v1 = vmax.f32 %v185_v63, 0.0 }
  0xdb   :  { %v226_v2 = vpack.c.bf16 %v214_v1, %v213_v0 }
  0xdd   :  { %322 = vmatmul.bf16.gmra.mxu1 %v226_v2 }
  0xde   :  { %v187_v4 = vpop.f32.mrf.mxu0 }
  0xdf   :  { %v188_v7 = vadd.f32 %v811_v25, %v187_v4 }
  0xe1   :  { %v215_v11 = vmax.f32 %v188_v7, 0.0 }
  0xe6   :  { %v189_v8 = vpop.f32.mrf.mxu0 }
  0xe7   :  { %v190_v9 = vadd.f32 %v811_v25, %v189_v8 }
  0xe9   :  { %v216_v12 = vmax.f32 %v190_v9, 0.0 }
  0xeb   :  { %v227_v13 = vpack.c.bf16 %v216_v12, %v215_v11 }
  0xed   :  { %327 = vmatmul.bf16.gmra.mxu1 %v227_v13 }
  0xee   :  { %v192_v14 = vpop.f32.mrf.mxu0 }
  0xef   :  { %v193_v15 = vadd.f32 %v811_v25, %v192_v14 }
  0xf1   :  { %v217_v18 = vmax.f32 %v193_v15, 0.0 }
  0xf6   :  { %v194_v16 = vpop.f32.mrf.mxu0 }
  0xf7   :  { %v195_v17 = vadd.f32 %v811_v25, %v194_v16 }
  0xf9   :  { %v218_v19 = vmax.f32 %v195_v17, 0.0 }
  0xfb   :  { %v228_v20 = vpack.c.bf16 %v218_v19, %v217_v18  ;;  %v695_v18 = vld [vmem:[%s913_s6] ss:$0 sm:$0xff] }
  0xfd   :  { %332 = vmatmul.bf16.gmra.mxu1 %v228_v20 }
 0x12a   :  { %v308_v25 = vpop.f32.mrf.mxu1 }
 0x12b   :  { %v309_v27 = vadd.f32 %v694_v26, %v308_v25 }
 0x12d   :  { %v348_v30 = vmax.f32 %v309_v27, 0.0 }
 0x132   :  { %v310_v28 = vpop.f32.mrf.mxu1 }
 0x133   :  { %v311_v29 = vadd.f32 %v694_v26, %v310_v28 }
 0x135   :  { %v349_v31 = vmax.f32 %v311_v29, 0.0 }
 0x136   :  { %v338_v32 = vpop.f32.mrf.mxu3 }
 0x137   :  { %v364_v33 = vpack.c.bf16 %v349_v31, %v348_v30  ;;  %v339_v35 = vadd.f32 %v694_v26, %v338_v32 }
 0x139   :  { %448 = vmatmul.bf16.vlgmr.msra.gmra.mxu2 %v364_v33  ;;  %v360_v37 = vmax.f32 %v339_v35, 0.0 }
 0x13a   :  { %v313_v34 = vpop.f32.mrf.mxu1 }
 0x13b   :  { %v314_v39 = vadd.f32 %v694_v26, %v313_v34 }
 0x13d   :  { %v350_v44 = vmax.f32 %v314_v39, 0.0 }
 0x13e   :  { %v340_v36 = vpop.f32.mrf.mxu3 }
 0x13f   :  { %v341_v38 = vadd.f32 %v694_v26, %v340_v36 }
 0x141   :  { %v361_v40 = vmax.f32 %v341_v38, 0.0 }
 0x142   :  { %v315_v41 = vpop.f32.mrf.mxu1 }
 0x143   :  { %v316_v42 = vadd.f32 %v694_v26, %v315_v41  ;;  %v370_v43 = vpack.c.bf16 %v361_v40, %v360_v37 }
 0x145   :  { %v351_v45 = vmax.f32 %v316_v42, 0.0  ;;  %478 = vmatmul.bf16.vlgmr.msra.gmra.mxu3 %v370_v43 }
 0x146   :  { %v343_v46 = vpop.f32.mrf.mxu3 }
 0x147   :  { %v365_v47 = vpack.c.bf16 %v351_v45, %v350_v44  ;;  %v344_v49 = vadd.f32 %v694_v26, %v343_v46 }
 0x149   :  { %453 = vmatmul.bf16.gmra.mxu2 %v365_v47  ;;  %v362_v51 = vmax.f32 %v344_v49, 0.0 }
 0x14a   :  { %v318_v48 = vpop.f32.mrf.mxu1 }
 0x14b   :  { %v319_v53 = vadd.f32 %v694_v26, %v318_v48 }
 0x14d   :  { %v352_v58 = vmax.f32 %v319_v53, 0.0 }
 0x14e   :  { %v345_v50 = vpop.f32.mrf.mxu3 }
 0x14f   :  { %v346_v52 = vadd.f32 %v694_v26, %v345_v50 }
 0x151   :  { %v363_v54 = vmax.f32 %v346_v52, 0.0 }
 0x152   :  { %v320_v55 = vpop.f32.mrf.mxu1 }
 0x153   :  { %v321_v56 = vadd.f32 %v694_v26, %v320_v55  ;;  %v371_v57 = vpack.c.bf16 %v363_v54, %v362_v51 }
 0x155   :  { %v353_v59 = vmax.f32 %v321_v56, 0.0  ;;  %483 = vmatmul.bf16.gmra.mxu3 %v371_v57 }
 0x157   :  { %v366_v60 = vpack.c.bf16 %v353_v59, %v352_v58 }
 0x159   :  { %458 = vmatmul.bf16.gmra.mxu2 %v366_v60 }
 0x15a   :  { %v323_v61 = vpop.f32.mrf.mxu1 }
 0x15b   :  { %v324_v62 = vadd.f32 %v694_v26, %v323_v61 }
 0x15d   :  { %v354_v1 = vmax.f32 %v324_v62, 0.0 }
 0x162   :  { %v325_v63 = vpop.f32.mrf.mxu1 }
 0x163   :  { %v326_v0 = vadd.f32 %v694_v26, %v325_v63 }
 0x165   :  { %v355_v2 = vmax.f32 %v326_v0, 0.0 }
 0x167   :  { %v367_v3 = vpack.c.bf16 %v355_v2, %v354_v1 }
 0x169   :  { %463 = vmatmul.bf16.gmra.mxu2 %v367_v3 }
 0x16a   :  { %v328_v4 = vpop.f32.mrf.mxu1 }
 0x16b   :  { %v329_v5 = vadd.f32 %v694_v26, %v328_v4 }
 0x16d   :  { %v356_v8 = vmax.f32 %v329_v5, 0.0 }
 0x172   :  { %v330_v6 = vpop.f32.mrf.mxu1 }
 0x173   :  { %v331_v7 = vadd.f32 %v694_v26, %v330_v6 }
 0x175   :  { %v357_v9 = vmax.f32 %v331_v7, 0.0 }
 0x177   :  { %v368_v10 = vpack.c.bf16 %v357_v9, %v356_v8 }
 0x179   :  { %468 = vmatmul.bf16.gmra.mxu2 %v368_v10 }
 0x17a   :  { %v333_v11 = vpop.f32.mrf.mxu1 }
 0x17b   :  { %v334_v12 = vadd.f32 %v694_v26, %v333_v11 }
 0x17d   :  { %v358_v15 = vmax.f32 %v334_v12, 0.0 }
 0x182   :  { %v335_v13 = vpop.f32.mrf.mxu1 }
 0x183   :  { %v336_v14 = vadd.f32 %v694_v26, %v335_v13 }
 0x185   :  { %v359_v16 = vmax.f32 %v336_v14, 0.0 }
 0x187   :  { %v369_v17 = vpack.c.bf16 %v359_v16, %v358_v15 }
 0x189   :  { %473 = vmatmul.bf16.gmra.mxu2 %v369_v17 }
 0x1bc   :  { %v449_v19 = vpop.f32.mrf.mxu2 }
 0x1bd   :  { %v450_v20 = vadd.f32 %v695_v18, %v449_v19 }
 0x1bf   :  { %489 = vst [vmem:[%s914_s7] sm:$0xff] %v450_v20 }
 0x1c4   :  { %v451_v21 = vpop.f32.mrf.mxu2 }
 0x1c5   :  { %v452_v22 = vadd.f32 %v695_v18, %v451_v21 }
 0x1c7   :  { %490 = vst [vmem:[%s914_s7 + $0x8] sm:$0xff] %v452_v22 }
 0x1c8   :  { %v479_v23 = vpop.f32.mrf.mxu3 }
 0x1c9   :  { %v480_v24 = vadd.f32 %v695_v18, %v479_v23 }
 0x1cb   :  { %501 = vst [vmem:[%s914_s7 + $0x60] sm:$0xff] %v480_v24 }
 0x1cc   :  { %v454_v25 = vpop.f32.mrf.mxu2 }
 0x1cd   :  { %v455_v26 = vadd.f32 %v695_v18, %v454_v25 }
 0x1cf   :  { %491 = vst [vmem:[%s914_s7 + $0x10] sm:$0xff] %v455_v26 }
 0x1d0   :  { %v481_v27 = vpop.f32.mrf.mxu3 }
 0x1d1   :  { %v482_v28 = vadd.f32 %v695_v18, %v481_v27 }
 0x1d3   :  { %502 = vst [vmem:[%s914_s7 + $0x68] sm:$0xff] %v482_v28 }
 0x1d4   :  { %v456_v29 = vpop.f32.mrf.mxu2 }
 0x1d5   :  { %v457_v30 = vadd.f32 %v695_v18, %v456_v29 }
 0x1d7   :  { %492 = vst [vmem:[%s914_s7 + $0x18] sm:$0xff] %v457_v30 }
 0x1d8   :  { %v484_v31 = vpop.f32.mrf.mxu3 }
 0x1d9   :  { %v485_v32 = vadd.f32 %v695_v18, %v484_v31 }
 0x1db   :  { %503 = vst [vmem:[%s914_s7 + $0x70] sm:$0xff] %v485_v32 }
 0x1dc   :  { %v459_v33 = vpop.f32.mrf.mxu2 }
 0x1dd   :  { %v460_v34 = vadd.f32 %v695_v18, %v459_v33 }
 0x1df   :  { %493 = vst [vmem:[%s914_s7 + $0x20] sm:$0xff] %v460_v34 }
 0x1e0   :  { %v486_v35 = vpop.f32.mrf.mxu3 }
 0x1e1   :  { %v487_v36 = vadd.f32 %v695_v18, %v486_v35 }
 0x1e3   :  { %504 = vst [vmem:[%s914_s7 + $0x78] sm:$0xff] %v487_v36 }
 0x1e4   :  { %v461_v37 = vpop.f32.mrf.mxu2 }
 0x1e5   :  { %v462_v38 = vadd.f32 %v695_v18, %v461_v37 }
 0x1e7   :  { %494 = vst [vmem:[%s914_s7 + $0x28] sm:$0xff] %v462_v38 }
 0x1ec   :  { %v464_v39 = vpop.f32.mrf.mxu2 }
 0x1ed   :  { %v465_v40 = vadd.f32 %v695_v18, %v464_v39 }
 0x1ef   :  { %495 = vst [vmem:[%s914_s7 + $0x30] sm:$0xff] %v465_v40 }
 0x1f4   :  { %v466_v41 = vpop.f32.mrf.mxu2 }
 0x1f5   :  { %v467_v42 = vadd.f32 %v695_v18, %v466_v41 }
 0x1f7   :  { %496 = vst [vmem:[%s914_s7 + $0x38] sm:$0xff] %v467_v42 }
 0x1fc   :  { %v469_v43 = vpop.f32.mrf.mxu2 }
 0x1fd   :  { %v470_v44 = vadd.f32 %v695_v18, %v469_v43 }
 0x1ff   :  { %497 = vst [vmem:[%s914_s7 + $0x40] sm:$0xff] %v470_v44 }
 0x204   :  { %v471_v45 = vpop.f32.mrf.mxu2 }
 0x205   :  { %v472_v46 = vadd.f32 %v695_v18, %v471_v45 }
 0x207   :  { %498 = vst [vmem:[%s914_s7 + $0x48] sm:$0xff] %v472_v46 }
 0x20c   :  { %v474_v47 = vpop.f32.mrf.mxu2 }
 0x20d   :  { %v475_v48 = vadd.f32 %v695_v18, %v474_v47 }
 0x20f   :  { %499 = vst [vmem:[%s914_s7 + $0x50] sm:$0xff] %v475_v48 }
 0x214   :  { %v476_v49 = vpop.f32.mrf.mxu2 }
 0x215   :  { %v477_v50 = vadd.f32 %v695_v18, %v476_v49 }
 0x217   :  { %500 = vst [vmem:[%s914_s7 + $0x58] sm:$0xff] %v477_v50 }

</bundles_post_ra>
